<compile_context>
chip_gen: v7x
topology: tpu7x:2x2x1
jax: 0.10.0
libtpu: 0.0.40
codegen_flags: <defaults>
</compile_context>

<pallas_src>
import functools

import jax
import jax.numpy as jnp
from jax.experimental import pallas as pl
from jax.experimental.pallas import tpu as pltpu


def _cdiv(a, b):
    return -(-a // b)


def _triplet_loss_kernel(a_ref, p_ref, n_ref, o_ref, *,
                         margin, eps, true_b, tb, k, d):
    """One batch tile: `tb` kernel rows, each holding k groups of d features."""
    f32 = jnp.float32
    a = a_ref[...].astype(f32)
    # eps is added to the elementwise difference (F.pairwise_distance).
    dp = a - p_ref[...].astype(f32) + eps
    dn = a - n_ref[...].astype(f32) + eps

    # Kernel-row index of every row in this tile; the original batch index of
    # group `grp` in kernel row `row` is row * k + grp (row-major packing).
    row = (pl.program_id(0) * tb
           + jax.lax.broadcasted_iota(jnp.int32, (tb, 1), 0))

    # TODO(synk): for very large D the lane reduction could additionally be
    # chunked with an unrolled fori_loop to shrink the live f32 working set.
    partial = jnp.float32(0.0)
    for grp in range(k):
        lo, hi = grp * d, (grp + 1) * d
        dps = dp[:, lo:hi]
        dns = dn[:, lo:hi]
        pos_d = jnp.sqrt(jnp.sum(dps * dps, axis=1, keepdims=True))   # (tb,1)
        neg_d = jnp.sqrt(jnp.sum(dns * dns, axis=1, keepdims=True))
        hinge = jnp.maximum(margin + pos_d - neg_d, 0.0)
        # Rows past the true batch (ragged last tile / packed tail) may hold
        # undefined data; the lane-wise select forces them to exactly 0.0, so
        # any NaN/Inf they produce never reaches the sum.
        hinge = jnp.where(row * k + grp < true_b, hinge, 0.0)
        partial = partial + jnp.sum(hinge)

    # Lane-dense (1, 8, 128) output block: partial sum in [0,0,0], zeros
    # elsewhere -> the epilogue is a plain jnp.sum (no strided gather).
    sub = jax.lax.broadcasted_iota(jnp.int32, (1, 8, 128), 1)
    lane = jax.lax.broadcasted_iota(jnp.int32, (1, 8, 128), 2)
    o_ref[...] = jnp.where((sub == 0) & (lane == 0), partial, 0.0)


def triplet_loss(anchor, positive, negative, *, margin=1.0, eps=1e-6,
                 tile_b=None):
    """Pallas TPU implementation of TripletLoss.forward. Returns a scalar."""
    assert anchor.shape == positive.shape == negative.shape
    assert anchor.ndim == 2, "expected (B, D) embeddings"
    B, D = anchor.shape
    itemsize = jnp.dtype(anchor.dtype).itemsize
    align = {4: 8, 2: 16, 1: 32}.get(itemsize, 8)   # sublane alignment

    # ---- lane packing for small D -----------------------------------------
    # (B, D) -> (B*D/128, 128) is a row-major reshape (no transpose), i.e.
    # zero extra HBM traffic, and fills every vreg lane / VMEM byte.
    if D < 128 and 128 % D == 0 and (B * D) % 128 == 0 and (128 // D) <= 8:
        k = 128 // D
        rows, kd = (B * D) // 128, 128
        anchor = anchor.reshape(rows, kd)
        positive = positive.reshape(rows, kd)
        negative = negative.reshape(rows, kd)
    else:
        k, rows, kd = 1, B, D

    # ---- generation-aware VMEM budget --------------------------------------
    try:
        info = pltpu.get_tpu_info()
        vmem_cap = int(getattr(info, "vmem_capacity_bytes", 64 * 1024 * 1024))
    except Exception:
        vmem_cap = 64 * 1024 * 1024                     # v7x-safe fallback
    # ~96 MiB on v5e/v6e (128 MiB physical), ~48 MiB on v7x (64 MiB per TC).
    vmem_limit = min((vmem_cap * 3) // 4, 96 * 1024 * 1024)
    vmem_limit = max(vmem_limit, 32 * 1024 * 1024)

    # Lane-padded width of one row in VMEM (tiles are (8,128) granular).
    lanes = _cdiv(kd, 128) * 128
    # 3 streams x 2 pipeline buffers in the input dtype, plus a conservative
    # ~12 f32-tile allowance for in-kernel temporaries / spills.
    per_row = 6 * lanes * itemsize + 12 * lanes * 4

    if tile_b is None:
        tb = max(1, (vmem_limit - 8 * 1024 * 1024) // per_row)
        if rows >= 4 * align:
            # Keep >= 4 grid steps so both v7x TensorCores get work and the
            # double-buffer always has a next block to prefetch.
            tb = min(tb, _cdiv(rows, 4))
    else:
        tb = max(1, int(tile_b))

    if tb >= rows:
        tb = rows                               # single block spans the batch
    else:
        tb = max(align, (tb // align) * align)  # (8,128) sublane alignment

    g = _cdiv(rows, tb)
    if tile_b is None and g > 1 and g % 2 == 1:
        # Prefer an even number of steps (v7x: two cores split the grid).
        tb2 = max(align, (_cdiv(rows, g + 1) // align) * align)
        if tb2 < rows and _cdiv(rows, tb2) % 2 == 0:
            tb = tb2
            g = _cdiv(rows, tb)

    kernel = functools.partial(_triplet_loss_kernel,
                               margin=float(margin), eps=float(eps),
                               true_b=B, tb=tb, k=k, d=D)

    in_spec = pl.BlockSpec((tb, kd), lambda i: (i, 0))

    partials = pl.pallas_call(
        kernel,
        out_shape=jax.ShapeDtypeStruct((g, 8, 128), jnp.float32),
        grid=(g,),
        in_specs=[in_spec, in_spec, in_spec],
        out_specs=pl.BlockSpec((1, 8, 128), lambda i: (i, 0, 0)),
        compiler_params=pltpu.CompilerParams(
            dimension_semantics=("parallel",),
            vmem_limit_bytes=int(vmem_limit)),
        cost_estimate=pl.CostEstimate(
            flops=8 * B * D,
            transcendentals=2 * B,
            bytes_accessed=3 * rows * kd * itemsize + g * 8 * 128 * 4),
    )(anchor, positive, negative)

    # Only one element per tile is non-zero, so a plain sum is exact.
    return jnp.sum(partials) / B


def _reference(anchor, positive, negative, margin=1.0, eps=1e-6):
    a = anchor.astype(jnp.float32)
    p = positive.astype(jnp.float32)
    n = negative.astype(jnp.float32)
    pos = jnp.sqrt(jnp.sum((a - p + eps) ** 2, axis=-1))
    neg = jnp.sqrt(jnp.sum((a - n + eps) ** 2, axis=-1))
    return jnp.mean(jnp.maximum(margin + pos - neg, 0.0))


if __name__ == "__main__":
    root = jax.random.PRNGKey(0)
    case_keys = jax.random.split(root, 4)

    def check(key, B, D, tile_b=None, margin=1.0):
        ka, kp, kn = jax.random.split(key, 3)
        a = jax.random.normal(ka, (B, D), dtype=jnp.float32)
        p = jax.random.normal(kp, (B, D), dtype=jnp.float32)
        n = jax.random.normal(kn, (B, D), dtype=jnp.float32)
        out = jax.block_until_ready(
            triplet_loss(a, p, n, margin=margin, tile_b=tile_b))
        ref = _reference(a, p, n, margin=margin)
        assert jnp.allclose(out, ref, rtol=1e-5, atol=1e-5), (B, D, out, ref)

    # 1) Packed (k=4), single tile — matches the module's simple usage.
    check(case_keys[0], 8, 32)
    # 2) Packed (k=2), forced small tile -> multi-tile grid + ragged last tile.
    check(case_keys[1], 50, 64, tile_b=8)
    # 3) Unpacked (128 % D != 0), multi-tile grid + ragged last tile.
    check(case_keys[2], 20, 48, tile_b=8)
    # 4) Default tile derivation + >=4-step grid heuristic.
    check(case_keys[3], 512, 32)

    print("KERNEL_OK")
</pallas_src>

<mosaic_0001>
module attributes {stable_mosaic.version = 11 : i64} {
  func.func @_triplet_loss_kernel(%arg0: i32, %arg1: memref<2x128xf32, #tpu.memory_space<vmem>>, %arg2: memref<2x128xf32, #tpu.memory_space<vmem>>, %arg3: memref<2x128xf32, #tpu.memory_space<vmem>>, %arg4: memref<1x8x128xf32, #tpu.memory_space<vmem>>) attributes {dimension_semantics = [#tpu.dimension_semantics<parallel>], iteration_bounds = array<i64: 1>, scalar_prefetch = 0 : i64, scratch_operands = 0 : i64, tpu.core_type = #tpu.core_type<tc>, window_params = [{transform_indices = @transform_0, window_bounds = array<i64: 2, 128>}, {transform_indices = @transform_1, window_bounds = array<i64: 2, 128>}, {transform_indices = @transform_2, window_bounds = array<i64: 2, 128>}, {transform_indices = @transform_3, window_bounds = array<i64: 1, 8, 128>}]} {
    %c0 = arith.constant 0 : index
    %c0_0 = arith.constant 0 : index
    %0 = vector.load %arg1[%c0, %c0_0] : memref<2x128xf32, #tpu.memory_space<vmem>>, vector<2x128xf32>
    %c0_1 = arith.constant 0 : index
    %c0_2 = arith.constant 0 : index
    %1 = vector.load %arg2[%c0_1, %c0_2] : memref<2x128xf32, #tpu.memory_space<vmem>>, vector<2x128xf32>
    %2 = arith.subf %0, %1 : vector<2x128xf32>
    %cst = arith.constant 9.99999997E-7 : f32
    %3 = vector.broadcast %cst : f32 to vector<2x128xf32>
    %4 = arith.addf %2, %3 : vector<2x128xf32>
    %c0_3 = arith.constant 0 : index
    %c0_4 = arith.constant 0 : index
    %5 = vector.load %arg3[%c0_3, %c0_4] : memref<2x128xf32, #tpu.memory_space<vmem>>, vector<2x128xf32>
    %6 = arith.subf %0, %5 : vector<2x128xf32>
    %cst_5 = arith.constant 9.99999997E-7 : f32
    %7 = vector.broadcast %cst_5 : f32 to vector<2x128xf32>
    %8 = arith.addf %6, %7 : vector<2x128xf32>
    %c2_i32 = arith.constant 2 : i32
    %9 = arith.muli %arg0, %c2_i32 : i32
    %10 = tpu.iota {dimensions = array<i32: 0>} : vector<2x1xi32>
    %11 = vector.broadcast %9 : i32 to vector<2x1xi32>
    %12 = arith.addi %11, %10 : vector<2x1xi32>
    %13 = vector.extract_strided_slice %4 {offsets = [0, 0], sizes = [2, 32], strides = [1, 1]} : vector<2x128xf32> to vector<2x32xf32>
    %14 = vector.extract_strided_slice %8 {offsets = [0, 0], sizes = [2, 32], strides = [1, 1]} : vector<2x128xf32> to vector<2x32xf32>
    %15 = arith.mulf %13, %13 : vector<2x32xf32>
    %cst_6 = arith.constant dense<0.000000e+00> : vector<2xf32>
    %16 = vector.multi_reduction <add>, %15, %cst_6 [1] : vector<2x32xf32> to vector<2xf32>
    %17 = vector.shape_cast %16 : vector<2xf32> to vector<2x1xf32>
    %18 = math.sqrt %17 : vector<2x1xf32>
    %19 = arith.mulf %14, %14 : vector<2x32xf32>
    %cst_7 = arith.constant dense<0.000000e+00> : vector<2xf32>
    %20 = vector.multi_reduction <add>, %19, %cst_7 [1] : vector<2x32xf32> to vector<2xf32>
    %21 = vector.shape_cast %20 : vector<2xf32> to vector<2x1xf32>
    %22 = math.sqrt %21 : vector<2x1xf32>
    %cst_8 = arith.constant 1.000000e+00 : f32
    %23 = vector.broadcast %cst_8 : f32 to vector<2x1xf32>
    %24 = arith.addf %23, %18 : vector<2x1xf32>
    %25 = arith.subf %24, %22 : vector<2x1xf32>
    %cst_9 = arith.constant 0.000000e+00 : f32
    %26 = vector.broadcast %cst_9 : f32 to vector<2x1xf32>
    %27 = arith.maximumf %25, %26 : vector<2x1xf32>
    %c4_i32 = arith.constant 4 : i32
    %28 = vector.broadcast %c4_i32 : i32 to vector<2x1xi32>
    %29 = arith.muli %12, %28 : vector<2x1xi32>
    %c0_i32 = arith.constant 0 : i32
    %30 = vector.broadcast %c0_i32 : i32 to vector<2x1xi32>
    %31 = arith.addi %29, %30 : vector<2x1xi32>
    %c8_i32 = arith.constant 8 : i32
    %32 = vector.broadcast %c8_i32 : i32 to vector<2x1xi32>
    %33 = arith.cmpi slt, %31, %32 : vector<2x1xi32>
    %cst_10 = arith.constant 0.000000e+00 : f32
    %34 = vector.broadcast %cst_10 : f32 to vector<2x1xf32>
    %35 = arith.select %33, %27, %34 : vector<2x1xi1>, vector<2x1xf32>
    %36 = vector.shape_cast %35 : vector<2x1xf32> to vector<1x2x1xf32>
    %cst_11 = arith.constant dense<0.000000e+00> : vector<1xf32>
    %37 = vector.multi_reduction <add>, %36, %cst_11 [1, 2] : vector<1x2x1xf32> to vector<1xf32>
    %38 = vector.shape_cast %37 : vector<1xf32> to vector<1x1x1xf32>
    %39 = vector.extract %38[0, 0, 0] : f32 from vector<1x1x1xf32>
    %cst_12 = arith.constant 0.000000e+00 : f32
    %40 = arith.addf %cst_12, %39 : f32
    %41 = vector.extract_strided_slice %4 {offsets = [0, 32], sizes = [2, 32], strides = [1, 1]} : vector<2x128xf32> to vector<2x32xf32>
    %42 = vector.extract_strided_slice %8 {offsets = [0, 32], sizes = [2, 32], strides = [1, 1]} : vector<2x128xf32> to vector<2x32xf32>
    %43 = arith.mulf %41, %41 : vector<2x32xf32>
    %cst_13 = arith.constant dense<0.000000e+00> : vector<2xf32>
    %44 = vector.multi_reduction <add>, %43, %cst_13 [1] : vector<2x32xf32> to vector<2xf32>
    %45 = vector.shape_cast %44 : vector<2xf32> to vector<2x1xf32>
    %46 = math.sqrt %45 : vector<2x1xf32>
    %47 = arith.mulf %42, %42 : vector<2x32xf32>
    %cst_14 = arith.constant dense<0.000000e+00> : vector<2xf32>
    %48 = vector.multi_reduction <add>, %47, %cst_14 [1] : vector<2x32xf32> to vector<2xf32>
    %49 = vector.shape_cast %48 : vector<2xf32> to vector<2x1xf32>
    %50 = math.sqrt %49 : vector<2x1xf32>
    %cst_15 = arith.constant 1.000000e+00 : f32
    %51 = vector.broadcast %cst_15 : f32 to vector<2x1xf32>
    %52 = arith.addf %51, %46 : vector<2x1xf32>
    %53 = arith.subf %52, %50 : vector<2x1xf32>
    %cst_16 = arith.constant 0.000000e+00 : f32
    %54 = vector.broadcast %cst_16 : f32 to vector<2x1xf32>
    %55 = arith.maximumf %53, %54 : vector<2x1xf32>
    %c4_i32_17 = arith.constant 4 : i32
    %56 = vector.broadcast %c4_i32_17 : i32 to vector<2x1xi32>
    %57 = arith.muli %12, %56 : vector<2x1xi32>
    %c1_i32 = arith.constant 1 : i32
    %58 = vector.broadcast %c1_i32 : i32 to vector<2x1xi32>
    %59 = arith.addi %57, %58 : vector<2x1xi32>
    %c8_i32_18 = arith.constant 8 : i32
    %60 = vector.broadcast %c8_i32_18 : i32 to vector<2x1xi32>
    %61 = arith.cmpi slt, %59, %60 : vector<2x1xi32>
    %cst_19 = arith.constant 0.000000e+00 : f32
    %62 = vector.broadcast %cst_19 : f32 to vector<2x1xf32>
    %63 = arith.select %61, %55, %62 : vector<2x1xi1>, vector<2x1xf32>
    %64 = vector.shape_cast %63 : vector<2x1xf32> to vector<1x2x1xf32>
    %cst_20 = arith.constant dense<0.000000e+00> : vector<1xf32>
    %65 = vector.multi_reduction <add>, %64, %cst_20 [1, 2] : vector<1x2x1xf32> to vector<1xf32>
    %66 = vector.shape_cast %65 : vector<1xf32> to vector<1x1x1xf32>
    %67 = vector.extract %66[0, 0, 0] : f32 from vector<1x1x1xf32>
    %68 = arith.addf %40, %67 : f32
    %69 = vector.extract_strided_slice %4 {offsets = [0, 64], sizes = [2, 32], strides = [1, 1]} : vector<2x128xf32> to vector<2x32xf32>
    %70 = vector.extract_strided_slice %8 {offsets = [0, 64], sizes = [2, 32], strides = [1, 1]} : vector<2x128xf32> to vector<2x32xf32>
    %71 = arith.mulf %69, %69 : vector<2x32xf32>
    %cst_21 = arith.constant dense<0.000000e+00> : vector<2xf32>
    %72 = vector.multi_reduction <add>, %71, %cst_21 [1] : vector<2x32xf32> to vector<2xf32>
    %73 = vector.shape_cast %72 : vector<2xf32> to vector<2x1xf32>
    %74 = math.sqrt %73 : vector<2x1xf32>
    %75 = arith.mulf %70, %70 : vector<2x32xf32>
    %cst_22 = arith.constant dense<0.000000e+00> : vector<2xf32>
    %76 = vector.multi_reduction <add>, %75, %cst_22 [1] : vector<2x32xf32> to vector<2xf32>
    %77 = vector.shape_cast %76 : vector<2xf32> to vector<2x1xf32>
    %78 = math.sqrt %77 : vector<2x1xf32>
    %cst_23 = arith.constant 1.000000e+00 : f32
    %79 = vector.broadcast %cst_23 : f32 to vector<2x1xf32>
    %80 = arith.addf %79, %74 : vector<2x1xf32>
    %81 = arith.subf %80, %78 : vector<2x1xf32>
    %cst_24 = arith.constant 0.000000e+00 : f32
    %82 = vector.broadcast %cst_24 : f32 to vector<2x1xf32>
    %83 = arith.maximumf %81, %82 : vector<2x1xf32>
    %c4_i32_25 = arith.constant 4 : i32
    %84 = vector.broadcast %c4_i32_25 : i32 to vector<2x1xi32>
    %85 = arith.muli %12, %84 : vector<2x1xi32>
    %c2_i32_26 = arith.constant 2 : i32
    %86 = vector.broadcast %c2_i32_26 : i32 to vector<2x1xi32>
    %87 = arith.addi %85, %86 : vector<2x1xi32>
    %c8_i32_27 = arith.constant 8 : i32
    %88 = vector.broadcast %c8_i32_27 : i32 to vector<2x1xi32>
    %89 = arith.cmpi slt, %87, %88 : vector<2x1xi32>
    %cst_28 = arith.constant 0.000000e+00 : f32
    %90 = vector.broadcast %cst_28 : f32 to vector<2x1xf32>
    %91 = arith.select %89, %83, %90 : vector<2x1xi1>, vector<2x1xf32>
    %92 = vector.shape_cast %91 : vector<2x1xf32> to vector<1x2x1xf32>
    %cst_29 = arith.constant dense<0.000000e+00> : vector<1xf32>
    %93 = vector.multi_reduction <add>, %92, %cst_29 [1, 2] : vector<1x2x1xf32> to vector<1xf32>
    %94 = vector.shape_cast %93 : vector<1xf32> to vector<1x1x1xf32>
    %95 = vector.extract %94[0, 0, 0] : f32 from vector<1x1x1xf32>
    %96 = arith.addf %68, %95 : f32
    %97 = vector.extract_strided_slice %4 {offsets = [0, 96], sizes = [2, 32], strides = [1, 1]} : vector<2x128xf32> to vector<2x32xf32>
    %98 = vector.extract_strided_slice %8 {offsets = [0, 96], sizes = [2, 32], strides = [1, 1]} : vector<2x128xf32> to vector<2x32xf32>
    %99 = arith.mulf %97, %97 : vector<2x32xf32>
    %cst_30 = arith.constant dense<0.000000e+00> : vector<2xf32>
    %100 = vector.multi_reduction <add>, %99, %cst_30 [1] : vector<2x32xf32> to vector<2xf32>
    %101 = vector.shape_cast %100 : vector<2xf32> to vector<2x1xf32>
    %102 = math.sqrt %101 : vector<2x1xf32>
    %103 = arith.mulf %98, %98 : vector<2x32xf32>
    %cst_31 = arith.constant dense<0.000000e+00> : vector<2xf32>
    %104 = vector.multi_reduction <add>, %103, %cst_31 [1] : vector<2x32xf32> to vector<2xf32>
    %105 = vector.shape_cast %104 : vector<2xf32> to vector<2x1xf32>
    %106 = math.sqrt %105 : vector<2x1xf32>
    %cst_32 = arith.constant 1.000000e+00 : f32
    %107 = vector.broadcast %cst_32 : f32 to vector<2x1xf32>
    %108 = arith.addf %107, %102 : vector<2x1xf32>
    %109 = arith.subf %108, %106 : vector<2x1xf32>
    %cst_33 = arith.constant 0.000000e+00 : f32
    %110 = vector.broadcast %cst_33 : f32 to vector<2x1xf32>
    %111 = arith.maximumf %109, %110 : vector<2x1xf32>
    %c4_i32_34 = arith.constant 4 : i32
    %112 = vector.broadcast %c4_i32_34 : i32 to vector<2x1xi32>
    %113 = arith.muli %12, %112 : vector<2x1xi32>
    %c3_i32 = arith.constant 3 : i32
    %114 = vector.broadcast %c3_i32 : i32 to vector<2x1xi32>
    %115 = arith.addi %113, %114 : vector<2x1xi32>
    %c8_i32_35 = arith.constant 8 : i32
    %116 = vector.broadcast %c8_i32_35 : i32 to vector<2x1xi32>
    %117 = arith.cmpi slt, %115, %116 : vector<2x1xi32>
    %cst_36 = arith.constant 0.000000e+00 : f32
    %118 = vector.broadcast %cst_36 : f32 to vector<2x1xf32>
    %119 = arith.select %117, %111, %118 : vector<2x1xi1>, vector<2x1xf32>
    %120 = vector.shape_cast %119 : vector<2x1xf32> to vector<1x2x1xf32>
    %cst_37 = arith.constant dense<0.000000e+00> : vector<1xf32>
    %121 = vector.multi_reduction <add>, %120, %cst_37 [1, 2] : vector<1x2x1xf32> to vector<1xf32>
    %122 = vector.shape_cast %121 : vector<1xf32> to vector<1x1x1xf32>
    %123 = vector.extract %122[0, 0, 0] : f32 from vector<1x1x1xf32>
    %124 = arith.addf %96, %123 : f32
    %125 = tpu.iota {dimensions = array<i32: 1>} : vector<1x8x128xi32>
    %126 = tpu.iota {dimensions = array<i32: 2>} : vector<1x8x128xi32>
    %c0_i32_38 = arith.constant 0 : i32
    %127 = vector.broadcast %c0_i32_38 : i32 to vector<1x8x128xi32>
    %128 = arith.cmpi eq, %125, %127 : vector<1x8x128xi32>
    %c0_i32_39 = arith.constant 0 : i32
    %129 = vector.broadcast %c0_i32_39 : i32 to vector<1x8x128xi32>
    %130 = arith.cmpi eq, %126, %129 : vector<1x8x128xi32>
    %131 = arith.andi %128, %130 : vector<1x8x128xi1>
    %cst_40 = arith.constant 0.000000e+00 : f32
    %132 = vector.broadcast %124 : f32 to vector<1x8x128xf32>
    %133 = vector.broadcast %cst_40 : f32 to vector<1x8x128xf32>
    %134 = arith.select %131, %132, %133 : vector<1x8x128xi1>, vector<1x8x128xf32>
    %c0_41 = arith.constant 0 : index
    %c0_42 = arith.constant 0 : index
    %c0_43 = arith.constant 0 : index
    %135 = vector.load %arg4[%c0_41, %c0_42, %c0_43] : memref<1x8x128xf32, #tpu.memory_space<vmem>>, vector<1x8x128xf32>
    tpu.vector_store %arg4[%c0_41, %c0_42, %c0_43], %134 {strides = array<i32>} : memref<1x8x128xf32, #tpu.memory_space<vmem>>, vector<1x8x128xf32>,
    return
  }
  func.func @transform_0(%arg0: i32) -> (i32, i32) {
    %c0_i32 = arith.constant 0 : i32
    %c0_i32_0 = arith.constant 0 : i32
    return %arg0, %c0_i32 : i32, i32
  }
  func.func @transform_1(%arg0: i32) -> (i32, i32) {
    %c0_i32 = arith.constant 0 : i32
    %c0_i32_0 = arith.constant 0 : i32
    return %arg0, %c0_i32 : i32, i32
  }
  func.func @transform_2(%arg0: i32) -> (i32, i32) {
    %c0_i32 = arith.constant 0 : i32
    %c0_i32_0 = arith.constant 0 : i32
    return %arg0, %c0_i32 : i32, i32
  }
  func.func @transform_3(%arg0: i32) -> (i32, i32, i32) {
    %c0_i32 = arith.constant 0 : i32
    %c0_i32_0 = arith.constant 0 : i32
    %c0_i32_1 = arith.constant 0 : i32
    return %arg0, %c0_i32, %c0_i32_0 : i32, i32, i32
  }
}

</mosaic_0001>

<bundles_post_ra>
// kernel: tpu_custom_call.1
= control target key start
LH: loop header
LB: loop body
LE: loop exit
PB: predicated region body
PF: predicated region fallthrough
CT: control target
= control target key end

     0   :  { %8 = vsyncpa [#allocation3], 0  ;;  %s391_s0 = inlined_call_operand.hbm [shape: f32[2,128], index: 0, kind: input, shape index: {}]   ;;  %s392_s1 = inlined_call_operand.vmem [shape: f32[2,128], index: 1, kind: input, shape index: {}]   ;;  %s393_s2 = inlined_call_operand.vmem [shape: f32[2,128], index: 2, kind: input, shape index: {}]   ;;  %s394_s3 = inlined_call_operand.hbm [shape: f32[1,8,128], index: 3, kind: output, shape index: {}]  }
   0x1   :  { %9 = vsyncpa [#allocation4], 0  ;;  %s311_s12 = smov [#allocation2]   ;;  %s263_s16 = scalar_lea.hbm %s391_s0, 32 }
   0x2   :  { %s16_s13 = sshll.u32 %s311_s12, 4  ;;  %p264_p0 = scmp.ne.s32.totalorder %s391_s0, %s263_s16  ;;  %s17_s13 = int_to_ptr.vmem [resolvable:$true] %s16_s13 }
   0x3   :  { %p267_p1 = scmp.lt.u32.totalorder %s263_s16, %s391_s0 }
   0x5   :  { %p269_p2 = pnand %p267_p1, %p264_p0 }
   0x7   :  { %272 = shalt.err (!%p269_p2)
}
   0x8   :  { %s273_s21 = scalar_lea.vmem %s17_s13, 32  ;;  %p278_p4 = scmp.lt.s32.totalorder %s17_s13, %s17_s13 }
   0x9   :  { %p274_p3 = scmp.ne.s32.totalorder %s17_s13, %s273_s21  ;;  %p279_p5 = scmp.lt.s32.totalorder %s273_s21, %s273_s21 }
   0xb   :  { %p280_p6 = por %p279_p5, %p278_p4 }
   0xd   :  { %p281_p7 = pnand %p280_p6, %p274_p3 }
   0xf   :  { %284 = shalt.err (!%p281_p7)
}
  0x10   :  { %19 = dma.hbm_to_vmem [thread:$0]  %s391_s0, 32, %s17_s13, [#allocation3]  }
  0x11   :  { %307 = dma.done.wait [#allocation3], 32  }
  0x12   :  { %308 = vsyncadd [#allocation3], 4294967264  ;;  %v27_v0 = vld [vmem:[#allocation2] sm:$0x3]  ;;  %s312_s28 = smov 96   ;;  %s313_s29 = smov 64   ;;  %v35_v25 = vlaneseq }
  0x13   :  { %v28_v1 = vld [vmem:[%s392_s1] sm:$0x3]  ;;  %s314_s0 = smov 32   ;;  %vm40_vm0 = vcmask 254976   ;;  %vm68_vm6 = vcmask 1024   ;;  %s315_s7 = smov [#allocation5]  }
  0x14   :  { %v31_v2 = vld [vmem:[%s393_s2] sm:$0x3]  ;;  %v29_v3 = vsub.f32 %v27_v0, %v28_v1  ;;  %v363_v29 = vshrl.u32 %v35_v25, 7  ;;  %s225_s8 = sshll.u32 %s315_s7, 4  ;;  %s226_s8 = int_to_ptr.vmem [resolvable:$true] %s225_s8 }
  0x15   :  { %v32_v4 = vsub.f32 %v27_v0, %v31_v2  ;;  %s285_s10 = scalar_lea.vmem %s226_s8, 128  ;;  %p290_p9 = scmp.lt.s32.totalorder %s226_s8, %s226_s8 }
  0x16   :  { %v30_v5 = vadd.f32 1e-06, %v29_v3  ;;  %v366_v36 = vmul.u32 4, %v363_v29  ;;  %p286_p8 = scmp.ne.s32.totalorder %s226_s8, %s285_s10  ;;  %p291_p10 = scmp.lt.s32.totalorder %s285_s10, %s285_s10 }
  0x17   :  { %v33_v6 = vadd.f32 1e-06, %v32_v4 }
  0x18   :  { %v39_v7 = vmul.f32 %v30_v5, %v30_v5  ;;  %vm66_vm5 = vcmp.lt.s32.totalorder %v366_v36, 8  ;;  %v111_v51 = vadd.s32 1, %v366_v36  ;;  %v154_v59 = vadd.s32 2, %v366_v36  ;;  %p292_p11 = por %p291_p10, %p290_p9 }
  0x19   :  { %v51_v8 = vmul.f32 %v33_v6, %v33_v6 }
  0x1a   :  { %81 = vrot.lane.b32.xlu0 %v39_v7, %s312_s28  ;;  %125 = vrot.lane.b32.xlu1 %v39_v7, %s313_s29  ;;  %v41_v9 = vsel %vm40_vm0, %v39_v7, 0.0  ;;  %vm112_vm9 = vcmp.lt.s32.totalorder %v111_v51, 8  ;;  %p293_p12 = pnand %p292_p11, %p286_p8 }
  0x1b   :  { %v52_v10 = vsel %vm40_vm0, %v51_v8, 0.0 }
  0x1e   :  { %95 = vrot.lane.b32.xlu0 %v51_v8, %s312_s28  ;;  %138 = vrot.lane.b32.xlu1 %v51_v8, %s313_s29 }
  0x22   :  { %168 = vrot.lane.b32.xlu0 %v39_v7, %s314_s0  ;;  %181 = vrot.lane.b32.xlu1 %v51_v8, %s314_s0 }
  0x41   :  { %42 = vadd.xlane.f32.xlu0 %v41_v9 }
  0x45   :  { %53 = vadd.xlane.f32.xlu0 %v52_v10 }
  0x8c   :  { %v82_v11 = vpop.permute.xlu0 %81  ;;  %v126_v12 = vpop.permute.xlu1 %125 }
  0x8d   :  { %v84_v13 = vsel %vm40_vm0, %v82_v11, 0.0  ;;  %v128_v14 = vsel %vm40_vm0, %v126_v12, 0.0 }
  0x8e   :  { %85 = vadd.xlane.f32.xlu1 %v84_v13 }
  0x90   :  { %v96_v15 = vpop.permute.xlu0 %95  ;;  %v139_v16 = vpop.permute.xlu1 %138 }
  0x91   :  { %v98_v17 = vsel %vm40_vm0, %v96_v15, 0.0  ;;  %v141_v18 = vsel %vm40_vm0, %v139_v16, 0.0 }
  0x92   :  { %129 = vadd.xlane.f32.xlu1 %v128_v14  ;;  %99 = vadd.xlane.f32.xlu0 %v98_v17 }
  0x94   :  { %v169_v19 = vpop.permute.xlu0 %168  ;;  %v182_v20 = vpop.permute.xlu1 %181 }
  0x95   :  { %v171_v21 = vsel %vm40_vm0, %v169_v19, 0.0  ;;  %v184_v22 = vsel %vm40_vm0, %v182_v20, 0.0 }
  0x96   :  { %172 = vadd.xlane.f32.xlu1 %v171_v21  ;;  %142 = vadd.xlane.f32.xlu0 %v141_v18  ;;  %v197_v18 = vadd.s32 3, %v366_v36 }
  0x9a   :  { %185 = vadd.xlane.f32.xlu0 %v184_v22 }
  0xce   :  { %v43_v23 = vpop.xlane.xlu0 %42 }
  0xcf   :  { %247 = vrsqrt.f32 %v43_v23  ;;  %vm46_vm1 = vcmp.eq.f32.partialorder %v43_v23, inf  ;;  %v49_v27 = vand.u32 2147483648, %v43_v23  ;;  %vm48_vm2 = vcmp.eq.f32.partialorder %v43_v23, 0.0 }
  0xd2   :  { %v54_v24 = vpop.xlane.xlu0 %53 }
  0xd3   :  { %249 = vrsqrt.f32 %v54_v24  ;;  %vm57_vm3 = vcmp.eq.f32.partialorder %v54_v24, inf  ;;  %v60_v33 = vand.u32 2147483648, %v54_v24  ;;  %vm59_vm4 = vcmp.eq.f32.partialorder %v54_v24, 0.0 }
  0xd9   :  { %v248_v26 = vpop.eup %247 }
  0xda   :  { %v45_v28 = vmul.f32 %v248_v26, %v43_v23 }
  0xdc   :  { %v47_v30 = vsel %vm46_vm1, %v43_v23, %v45_v28 }
  0xdd   :  { %v250_v31 = vpop.eup %249  ;;  %v50_v32 = vsel %vm48_vm2, %v49_v27, %v47_v30  ;;  %vm155_vm2 = vcmp.lt.s32.totalorder %v154_v59, 8 }
  0xde   :  { %v56_v34 = vmul.f32 %v250_v31, %v54_v24  ;;  %v62_v35 = vadd.f32 1.0, %v50_v32 }
  0xe0   :  { %v58_v37 = vsel %vm57_vm3, %v54_v24, %v56_v34 }
  0xe1   :  { %v61_v38 = vsel %vm59_vm4, %v60_v33, %v58_v37 }
  0xe2   :  { %v63_v39 = vsub.f32 %v62_v35, %v61_v38 }
  0xe4   :  { %v64_v40 = vmax.f32 %v63_v39, 0.0 }
  0xe6   :  { %v67_v41 = vsel %vm66_vm5, %v64_v40, 0.0  ;;  %vm198_vm5 = vcmp.lt.s32.totalorder %v197_v18, 8 }
  0xe7   :  { %v69_v42 = vsel %vm68_vm6, %v67_v41, 0.0 }
  0xe8   :  { %70 = vadd.xlane.f32.xlu1 %v69_v42 }
 0x11b   :  { %v86_v43 = vpop.xlane.xlu1 %85 }
 0x11c   :  { %251 = vrsqrt.f32 %v86_v43  ;;  %vm89_vm7 = vcmp.eq.f32.partialorder %v86_v43, inf  ;;  %v92_v53 = vand.u32 2147483648, %v86_v43  ;;  %vm91_vm8 = vcmp.eq.f32.partialorder %v86_v43, 0.0 }
 0x11f   :  { %v130_v44 = vpop.xlane.xlu1 %129  ;;  %v100_v45 = vpop.xlane.xlu0 %99 }
 0x120   :  { %253 = vrsqrt.f32 %v130_v44  ;;  %vm133_vm10 = vcmp.eq.f32.partialorder %v130_v44, inf  ;;  %vm103_vm11 = vcmp.eq.f32.partialorder %v100_v45, inf  ;;  %v106_v60 = vand.u32 2147483648, %v100_v45 }
 0x121   :  { %255 = vrsqrt.f32 %v100_v45  ;;  %v136_v62 = vand.u32 2147483648, %v130_v44  ;;  %vm105_vm12 = vcmp.eq.f32.partialorder %v100_v45, 0.0  ;;  %vm135_vm13 = vcmp.eq.f32.partialorder %v130_v44, 0.0 }
 0x123   :  { %v173_v46 = vpop.xlane.xlu1 %172  ;;  %v143_v47 = vpop.xlane.xlu0 %142 }
 0x124   :  { %257 = vrsqrt.f32 %v173_v46  ;;  %vm146_vm14 = vcmp.eq.f32.partialorder %v143_v47, inf  ;;  %vm176_vm15 = vcmp.eq.f32.partialorder %v173_v46, inf  ;;  %v179_v8 = vand.u32 2147483648, %v173_v46 }
 0x125   :  { %259 = vrsqrt.f32 %v143_v47  ;;  %vm148_vm0 = vcmp.eq.f32.partialorder %v143_v47, 0.0  ;;  %v149_v9 = vand.u32 2147483648, %v143_v47  ;;  %vm178_vm1 = vcmp.eq.f32.partialorder %v173_v46, 0.0 }
 0x126   :  { %v252_v48 = vpop.eup %251 }
 0x127   :  { %v88_v49 = vmul.f32 %v252_v48, %v86_v43  ;;  %v186_v50 = vpop.xlane.xlu0 %185 }
 0x128   :  { %261 = vrsqrt.f32 %v186_v50  ;;  %vm189_vm3 = vcmp.eq.f32.partialorder %v186_v50, inf  ;;  %v192_v21 = vand.u32 2147483648, %v186_v50  ;;  %vm191_vm4 = vcmp.eq.f32.partialorder %v186_v50, 0.0 }
 0x129   :  { %v90_v52 = vsel %vm89_vm7, %v86_v43, %v88_v49 }
 0x12a   :  { %v254_v54 = vpop.eup %253  ;;  %v93_v57 = vsel %vm91_vm8, %v92_v53, %v90_v52 }
 0x12b   :  { %v256_v55 = vpop.eup %255  ;;  %v132_v56 = vmul.f32 %v254_v54, %v130_v44  ;;  %v108_v1 = vadd.f32 1.0, %v93_v57 }
 0x12c   :  { %v102_v58 = vmul.f32 %v256_v55, %v100_v45 }
 0x12d   :  { %v134_v61 = vsel %vm133_vm10, %v130_v44, %v132_v56 }
 0x12e   :  { %v258_v63 = vpop.eup %257  ;;  %v104_v0 = vsel %vm103_vm11, %v100_v45, %v102_v58  ;;  %v137_v5 = vsel %vm135_vm13, %v136_v62, %v134_v61 }
 0x12f   :  { %v260_v2 = vpop.eup %259  ;;  %v175_v3 = vmul.f32 %v258_v63, %v173_v46  ;;  %v107_v4 = vsel %vm105_vm12, %v106_v60, %v104_v0  ;;  %v151_v14 = vadd.f32 1.0, %v137_v5  ;;  %v212_v63 = vand.u32 127, %v35_v25 }
 0x130   :  { %v109_v6 = vsub.f32 %v108_v1, %v107_v4  ;;  %v145_v7 = vmul.f32 %v260_v2, %v143_v47 }
 0x131   :  { %v177_v10 = vsel %vm176_vm15, %v173_v46, %v175_v3  ;;  %vm214_vm7 = vcmp.eq.s32.totalorder %v212_v63, 0 }
 0x132   :  { %v262_v11 = vpop.eup %261  ;;  %v110_v12 = vmax.f32 %v109_v6, 0.0  ;;  %v147_v13 = vsel %vm146_vm14, %v143_v47, %v145_v7  ;;  %v180_v15 = vsel %vm178_vm1, %v179_v8, %v177_v10 }
 0x133   :  { %v150_v16 = vsel %vm148_vm0, %v149_v9, %v147_v13  ;;  %v188_v17 = vmul.f32 %v262_v11, %v186_v50  ;;  %v194_v24 = vadd.f32 1.0, %v180_v15 }
 0x134   :  { %v113_v19 = vsel %vm112_vm9, %v110_v12, 0.0  ;;  %v152_v20 = vsub.f32 %v151_v14, %v150_v16 }
 0x135   :  { %v114_v22 = vsel %vm68_vm6, %v113_v19, 0.0  ;;  %v190_v23 = vsel %vm189_vm3, %v186_v50, %v188_v17 }
 0x136   :  { %115 = vadd.xlane.f32.xlu0 %v114_v22  ;;  %v153_v26 = vmax.f32 %v152_v20, 0.0  ;;  %v193_v27 = vsel %vm191_vm4, %v192_v21, %v190_v23 }
 0x137   :  { %v195_v28 = vsub.f32 %v194_v24, %v193_v27 }
 0x138   :  { %v156_v30 = vsel %vm155_vm2, %v153_v26, 0.0 }
 0x139   :  { %v157_v31 = vsel %vm68_vm6, %v156_v30, 0.0  ;;  %v196_v32 = vmax.f32 %v195_v28, 0.0 }
 0x13a   :  { %158 = vadd.xlane.f32.xlu1 %v157_v31 }
 0x13b   :  { %v199_v33 = vsel %vm198_vm5, %v196_v32, 0.0 }
 0x13c   :  { %v200_v34 = vsel %vm68_vm6, %v199_v33, 0.0  ;;  %vm213_vm6 = vcmp.eq.s32.totalorder %v363_v29, 0 }
 0x13d   :  { %201 = vadd.xlane.f32.xlu0 %v200_v34  ;;  %vm215_vm8 = vmand %vm213_vm6, %vm214_vm7 }
 0x175   :  { %v71_v35 = vpop.xlane.xlu1 %70 }
 0x176   :  { %v72_v36 = vrot.slane %v71_v35, 4 }
 0x178   :  { %v73_v37 = vadd.f32 %v72_v36, %v71_v35 }
 0x17a   :  { %v74_v38 = vrot.slane %v73_v37, 2 }
 0x17c   :  { %v75_v39 = vadd.f32 %v74_v38, %v73_v37 }
 0x17e   :  { %v76_v40 = vrot.slane %v75_v39, 1 }
 0x180   :  { %v77_v41 = vadd.f32 %v76_v40, %v75_v39 }
 0x182   :  { %234 = vpush %v77_v41 }
 0x1b3   :  { %s235_s1 = spop %234 }
 0x1c3   :  { %v116_v42 = vpop.xlane.xlu0 %115 }
 0x1c4   :  { %v117_v43 = vrot.slane %v116_v42, 4 }
 0x1c6   :  { %v118_v44 = vadd.f32 %v117_v43, %v116_v42 }
 0x1c7   :  { %v159_v45 = vpop.xlane.xlu1 %158 }
 0x1c8   :  { %v119_v46 = vrot.slane %v118_v44, 2  ;;  %v160_v47 = vrot.slane %v159_v45, 4 }
 0x1ca   :  { %v161_v48 = vadd.f32 %v160_v47, %v159_v45  ;;  %v202_v49 = vpop.xlane.xlu0 %201  ;;  %v120_v50 = vadd.f32 %v119_v46, %v118_v44 }
 0x1cb   :  { %v203_v51 = vrot.slane %v202_v49, 4 }
 0x1cc   :  { %v162_v52 = vrot.slane %v161_v48, 2  ;;  %v121_v53 = vrot.slane %v120_v50, 1 }
 0x1cd   :  { %v204_v54 = vadd.f32 %v203_v51, %v202_v49 }
 0x1ce   :  { %v163_v55 = vadd.f32 %v162_v52, %v161_v48  ;;  %v122_v56 = vadd.f32 %v121_v53, %v120_v50 }
 0x1cf   :  { %v205_v57 = vrot.slane %v204_v54, 2 }
 0x1d0   :  { %236 = vpush %v122_v56  ;;  %v164_v58 = vrot.slane %v163_v55, 1 }
 0x1d1   :  { %v206_v59 = vadd.f32 %v205_v57, %v204_v54 }
 0x1d2   :  { %v165_v60 = vadd.f32 %v164_v58, %v163_v55 }
 0x1d3   :  { %v207_v61 = vrot.slane %v206_v59, 1 }
 0x1d4   :  { %238 = vpush %v165_v60 }
 0x1d5   :  { %v208_v62 = vadd.f32 %v207_v61, %v206_v59 }
 0x1d7   :  { %240 = vpush %v208_v62 }
 0x201   :  { %s237_s2 = spop %236 }
 0x202   :  { %s124_s30 = sadd.f32 %s237_s2, %s235_s1 }
 0x205   :  { %s239_s4 = spop %238 }
 0x206   :  { %s167_s5 = sadd.f32 %s239_s4, %s124_s30 }
 0x208   :  { %s241_s6 = spop %240 }
 0x209   :  { %s210_s9 = sadd.f32 %s241_s6, %s167_s5 }
 0x20b   :  { %v216_v0 = vstv %s210_s9 }
 0x20c   :  { %v217_v1 = vsel %vm215_vm8, %v216_v0, 0.0 }
 0x20d   :  { %218 = vst [vmem:[#allocation5] sm:$0xff] %v217_v1 }
 0x20e   :  { %296 = shalt.err (!%p293_p12)
}
 0x20f   :  { %s297_s13 = scalar_lea.hbm %s394_s3, 128 }
 0x210   :  { %p298_p13 = scmp.ne.s32.totalorder %s394_s3, %s297_s13  ;;  %p301_p0 = scmp.lt.u32.totalorder %s297_s13, %s394_s3 }
 0x212   :  { %p303_p1 = pnand %p301_p0, %p298_p13 }
 0x214   :  { %306 = shalt.err (!%p303_p1)
}
 0x215   :  { %228 = dma.vmem_to_hbm [thread:$0]  %s226_s8, 128, %s394_s3, [#allocation4]  }
 0x216   :  { %309 = dma.done.wait [#allocation4], 128  }
 0x217   :  { %310 = vsyncadd [#allocation4], 4294967168 }
 0x218   :  { %232 = vsyncpa [#allocation3], 1 }
 0x219   :  { %233 = vsyncpa [#allocation4], 1 }

</bundles_post_ra>
